<compile_context>
chip_gen: v6e
topology: v6e:2x2x1
jax: 0.10.0
libtpu: 0.0.40
codegen_flags: <defaults>
</compile_context>

<pallas_src>
import functools

import jax
import jax.numpy as jnp
from jax.experimental import pallas as pl
from jax.experimental.pallas import tpu as pltpu

_HEAD_PAD = 8  # zero-padded width of the fused (fc_linear | fc_angular) head


def _actor_kernel(x_ref, w1_ref, b1_ref, w2_ref, b2_ref, w3_ref, b3_ref,
                  wh_ref, bh_ref, mean_ref):
    cdt = w1_ref.dtype          # matmul / elementwise compute dtype (bf16)
    f32 = jnp.float32

    x = x_ref[...].astype(cdt)  # f32 tile -> compute dtype, in-kernel

    # fc1 -> relu   (bf16 MXU, f32 accumulate, bf16 bias+relu)
    h = jnp.dot(x, w1_ref[...], preferred_element_type=f32).astype(cdt)
    h = jnp.maximum(h + b1_ref[...], 0)                          # (TB, 256)

    # fc2 -> relu
    h = jnp.dot(h, w2_ref[...], preferred_element_type=f32).astype(cdt)
    h = jnp.maximum(h + b2_ref[...], 0)                          # (TB, 256)

    # f3 -> relu
    h = jnp.dot(h, w3_ref[...], preferred_element_type=f32).astype(cdt)
    h = jnp.maximum(h + b3_ref[...], 0)                          # (TB, 128)

    # fused heads (zero-padded to 8 cols) -> tanh, f32 store
    heads = jnp.dot(h, wh_ref[...], preferred_element_type=f32) + bh_ref[...]
    mean_ref[...] = jnp.tanh(heads)                              # (TB, 8)


def _round_up(n, m):
    return ((n + m - 1) // m) * m


def prepare_actor_params(params, matmul_dtype=jnp.bfloat16):
    """One-time cast/pad of parameters (outside the per-call forward path)."""
    n_actions = params["wh"].shape[-1]
    pad = _HEAD_PAD - n_actions
    return {
        "w1": params["w1"].astype(matmul_dtype),
        "b1": params["b1"].astype(matmul_dtype),
        "w2": params["w2"].astype(matmul_dtype),
        "b2": params["b2"].astype(matmul_dtype),
        "w3": params["w3"].astype(matmul_dtype),
        "b3": params["b3"].astype(matmul_dtype),
        "wh": jnp.pad(params["wh"], ((0, 0), (0, pad))).astype(matmul_dtype),
        "bh": jnp.pad(params["bh"], ((0, 0), (0, pad))).astype(jnp.float32),
        "log_std": params["log_std"].astype(jnp.float32),
    }


@functools.partial(jax.jit, static_argnames=("tb",))
def actor_forward(x, prep, *, tb=256):
    """Actor forward pass. x: (B, n_states) f32. Returns (mean, std), (B, n_actions)."""
    B, n_states = x.shape
    n_actions = prep["log_std"].shape[-1]

    # Batch tile: multiple of 16, at most tb; ensure >=2 grid steps once the
    # batch is big enough to split across v7x's two TensorCores.
    tb_eff = max(16, _round_up(min(tb, B), 16))
    if B > 64:
        tb_eff = min(tb_eff, _round_up(pl.cdiv(B, 2), 16))
    grid = (pl.cdiv(B, tb_eff),)   # ragged last block handled by Pallas masking

    def full_spec(arr):
        # whole (2-D) parameter resident in VMEM for every grid step
        return pl.BlockSpec(arr.shape, lambda i: (0, 0))

    mean_full = pl.pallas_call(
        _actor_kernel,
        out_shape=jax.ShapeDtypeStruct((B, _HEAD_PAD), jnp.float32),
        grid_spec=pltpu.PrefetchScalarGridSpec(
            num_scalar_prefetch=0,
            grid=grid,
            in_specs=[
                pl.BlockSpec((tb_eff, n_states), lambda i: (i, 0)),   # x tile
                full_spec(prep["w1"]), full_spec(prep["b1"]),         # fc1
                full_spec(prep["w2"]), full_spec(prep["b2"]),         # fc2
                full_spec(prep["w3"]), full_spec(prep["b3"]),         # f3
                full_spec(prep["wh"]), full_spec(prep["bh"]),         # fused head
            ],
            out_specs=pl.BlockSpec((tb_eff, _HEAD_PAD), lambda i: (i, 0)),
        ),
        compiler_params=pltpu.CompilerParams(
            dimension_semantics=("parallel",),   # shards batch tiles across TCs
            vmem_limit_bytes=32 * 1024 * 1024,
        ),
    )(x, prep["w1"], prep["b1"], prep["w2"], prep["b2"],
      prep["w3"], prep["b3"], prep["wh"], prep["bh"])

    mean = mean_full[:, :n_actions]
    # std = exp(log_std).expand_as(mean): input-independent -> computed here.
    std = jnp.broadcast_to(jnp.exp(prep["log_std"]), mean.shape)
    return mean, std


def init_actor_params(key, n_states, n_actions=2):
    """PyTorch nn.Linear-style init (U[-1/sqrt(fan_in), +1/sqrt(fan_in)])."""
    def linear(key, fan_in, fan_out):
        kw, kb = jax.random.split(key)
        bound = 1.0 / jnp.sqrt(float(fan_in))
        w = jax.random.uniform(kw, (fan_in, fan_out), jnp.float32, -bound, bound)
        b = jax.random.uniform(kb, (1, fan_out), jnp.float32, -bound, bound)
        return w, b

    k1, k2, k3, k4, k5 = jax.random.split(key, 5)
    w1, b1 = linear(k1, n_states, 256)
    w2, b2 = linear(k2, 256, 256)
    w3, b3 = linear(k3, 256, 128)
    w_lin, b_lin = linear(k4, 128, 1)
    w_ang, b_ang = linear(k5, 128, 1)
    # fuse fc_linear / fc_angular: col 0 = linear, col 1 = angular
    # (matches torch.cat([mean_linear, mean_angular], dim=-1)).
    wh = jnp.concatenate([w_lin, w_ang], axis=-1)
    bh = jnp.concatenate([b_lin, b_ang], axis=-1)
    log_std = jnp.full((n_actions,), -1.5, dtype=jnp.float32)
    return {"w1": w1, "b1": b1, "w2": w2, "b2": b2, "w3": w3, "b3": b3,
            "wh": wh, "bh": bh, "log_std": log_std}


def actor_forward_ref(x, p, matmul_dtype=jnp.bfloat16):
    """Pure-JAX reference mirroring the kernel's compute-dtype path."""
    cdt = matmul_dtype
    f32 = jnp.float32

    def layer(a, w, b):
        h = jnp.dot(a.astype(cdt), w.astype(cdt), preferred_element_type=f32)
        return jnp.maximum(h.astype(cdt) + b.astype(cdt), 0)

    h = layer(x, p["w1"], p["b1"])
    h = layer(h, p["w2"], p["b2"])
    h = layer(h, p["w3"], p["b3"])
    mean = jnp.tanh(jnp.dot(h.astype(cdt), p["wh"].astype(cdt),
                            preferred_element_type=f32) + p["bh"].astype(f32))
    std = jnp.broadcast_to(jnp.exp(p["log_std"].astype(f32)), mean.shape)
    return mean, std


def actor_forward_ref_f32(x, p):
    """Pure-f32 PyTorch-style semantics (sanity check, loose tolerance)."""
    h = jax.nn.relu(x @ p["w1"] + p["b1"])
    h = jax.nn.relu(h @ p["w2"] + p["b2"])
    h = jax.nn.relu(h @ p["w3"] + p["b3"])
    mean = jnp.tanh(h @ p["wh"] + p["bh"])
    std = jnp.broadcast_to(jnp.exp(p["log_std"]), mean.shape)
    return mean, std


if __name__ == "__main__":
    key = jax.random.PRNGKey(0)
    k_params, k_x1, k_x2 = jax.random.split(key, 3)

    n_states = 32      # small example state dimension
    n_actions = 2      # fc_linear + fc_angular -> 2 action means

    params = init_actor_params(k_params, n_states, n_actions)
    prep = prepare_actor_params(params)

    ok = True
    for k_x, batch in ((k_x1, 40), (k_x2, 200)):   # ragged block; multi-step grid
        x = jax.random.normal(k_x, (batch, n_states), dtype=jnp.float32)

        mean, std = actor_forward(x, prep, tb=256)
        jax.block_until_ready((mean, std))

        mean_ref, std_ref = actor_forward_ref(x, params)
        mean_f32, _ = actor_forward_ref_f32(x, params)

        assert mean.shape == (batch, n_actions) and std.shape == (batch, n_actions)
        assert jnp.allclose(mean, mean_ref, atol=2e-3, rtol=2e-3), "mean mismatch"
        assert jnp.allclose(std, std_ref, atol=1e-6, rtol=1e-6), "std mismatch"
        assert jnp.allclose(mean, mean_f32, atol=5e-2, rtol=5e-2), "f32 sanity mismatch"

    if ok:
        print("KERNEL_OK")
</pallas_src>

<mosaic_0001>
module attributes {stable_mosaic.version = 11 : i64} {
  func.func @_actor_kernel(%arg0: i32, %arg1: memref<48x32xf32, #tpu.memory_space<vmem>>, %arg2: memref<32x256xbf16, #tpu.memory_space<vmem>>, %arg3: memref<1x256xbf16, #tpu.memory_space<vmem>>, %arg4: memref<256x256xbf16, #tpu.memory_space<vmem>>, %arg5: memref<1x256xbf16, #tpu.memory_space<vmem>>, %arg6: memref<256x128xbf16, #tpu.memory_space<vmem>>, %arg7: memref<1x128xbf16, #tpu.memory_space<vmem>>, %arg8: memref<128x8xbf16, #tpu.memory_space<vmem>>, %arg9: memref<1x8xf32, #tpu.memory_space<vmem>>, %arg10: memref<48x8xf32, #tpu.memory_space<vmem>>) attributes {dimension_semantics = [#tpu.dimension_semantics<parallel>], iteration_bounds = array<i64: 1>, scalar_prefetch = 0 : i64, scratch_operands = 0 : i64, tpu.core_type = #tpu.core_type<tc>, window_params = [{transform_indices = @transform_0, window_bounds = array<i64: 48, 32>}, {pipeline_mode = #tpu.pipeline_mode<synchronous>, transform_indices = @transform_1, window_bounds = array<i64: 32, 256>}, {pipeline_mode = #tpu.pipeline_mode<synchronous>, transform_indices = @transform_2, window_bounds = array<i64: 1, 256>}, {pipeline_mode = #tpu.pipeline_mode<synchronous>, transform_indices = @transform_3, window_bounds = array<i64: 256, 256>}, {pipeline_mode = #tpu.pipeline_mode<synchronous>, transform_indices = @transform_4, window_bounds = array<i64: 1, 256>}, {pipeline_mode = #tpu.pipeline_mode<synchronous>, transform_indices = @transform_5, window_bounds = array<i64: 256, 128>}, {pipeline_mode = #tpu.pipeline_mode<synchronous>, transform_indices = @transform_6, window_bounds = array<i64: 1, 128>}, {pipeline_mode = #tpu.pipeline_mode<synchronous>, transform_indices = @transform_7, window_bounds = array<i64: 128, 8>}, {pipeline_mode = #tpu.pipeline_mode<synchronous>, transform_indices = @transform_8, window_bounds = array<i64: 1, 8>}, {transform_indices = @transform_9, window_bounds = array<i64: 48, 8>}]} {
    %c0 = arith.constant 0 : index
    %c0_0 = arith.constant 0 : index
    %0 = vector.load %arg1[%c0, %c0_0] : memref<48x32xf32, #tpu.memory_space<vmem>>, vector<48x32xf32>
    %1 = arith.truncf %0 : vector<48x32xf32> to vector<48x32xbf16>
    %c0_1 = arith.constant 0 : index
    %c0_2 = arith.constant 0 : index
    %2 = vector.load %arg2[%c0_1, %c0_2] : memref<32x256xbf16, #tpu.memory_space<vmem>>, vector<32x256xbf16>
    %cst = arith.constant dense<0.000000e+00> : vector<48x256xf32>
    %3 = tpu.matmul %1, %2, %cst {dimension_numbers = #tpu.dot_dimension_numbers<[1], [0], [0], [1], [0, 0, 1, 1], [], []>} : vector<48x32xbf16>, vector<32x256xbf16>, vector<48x256xf32> -> vector<48x256xf32>
    %4 = arith.truncf %3 : vector<48x256xf32> to vector<48x256xbf16>
    %c0_3 = arith.constant 0 : index
    %c0_4 = arith.constant 0 : index
    %5 = vector.load %arg3[%c0_3, %c0_4] : memref<1x256xbf16, #tpu.memory_space<vmem>>, vector<1x256xbf16>
    %6 = vector.broadcast %5 : vector<1x256xbf16> to vector<48x256xbf16>
    %7 = arith.addf %4, %6 : vector<48x256xbf16>
    %cst_5 = arith.constant 0.000000e+00 : bf16
    %8 = vector.broadcast %cst_5 : bf16 to vector<48x256xbf16>
    %9 = arith.maximumf %7, %8 : vector<48x256xbf16>
    %c0_6 = arith.constant 0 : index
    %c0_7 = arith.constant 0 : index
    %10 = vector.load %arg4[%c0_6, %c0_7] : memref<256x256xbf16, #tpu.memory_space<vmem>>, vector<256x256xbf16>
    %cst_8 = arith.constant dense<0.000000e+00> : vector<48x256xf32>
    %11 = tpu.matmul %9, %10, %cst_8 {dimension_numbers = #tpu.dot_dimension_numbers<[1], [0], [0], [1], [0, 0, 1, 1], [], []>} : vector<48x256xbf16>, vector<256x256xbf16>, vector<48x256xf32> -> vector<48x256xf32>
    %12 = arith.truncf %11 : vector<48x256xf32> to vector<48x256xbf16>
    %c0_9 = arith.constant 0 : index
    %c0_10 = arith.constant 0 : index
    %13 = vector.load %arg5[%c0_9, %c0_10] : memref<1x256xbf16, #tpu.memory_space<vmem>>, vector<1x256xbf16>
    %14 = vector.broadcast %13 : vector<1x256xbf16> to vector<48x256xbf16>
    %15 = arith.addf %12, %14 : vector<48x256xbf16>
    %cst_11 = arith.constant 0.000000e+00 : bf16
    %16 = vector.broadcast %cst_11 : bf16 to vector<48x256xbf16>
    %17 = arith.maximumf %15, %16 : vector<48x256xbf16>
    %c0_12 = arith.constant 0 : index
    %c0_13 = arith.constant 0 : index
    %18 = vector.load %arg6[%c0_12, %c0_13] : memref<256x128xbf16, #tpu.memory_space<vmem>>, vector<256x128xbf16>
    %cst_14 = arith.constant dense<0.000000e+00> : vector<48x128xf32>
    %19 = tpu.matmul %17, %18, %cst_14 {dimension_numbers = #tpu.dot_dimension_numbers<[1], [0], [0], [1], [0, 0, 1, 1], [], []>} : vector<48x256xbf16>, vector<256x128xbf16>, vector<48x128xf32> -> vector<48x128xf32>
    %20 = arith.truncf %19 : vector<48x128xf32> to vector<48x128xbf16>
    %c0_15 = arith.constant 0 : index
    %c0_16 = arith.constant 0 : index
    %21 = vector.load %arg7[%c0_15, %c0_16] : memref<1x128xbf16, #tpu.memory_space<vmem>>, vector<1x128xbf16>
    %22 = vector.broadcast %21 : vector<1x128xbf16> to vector<48x128xbf16>
    %23 = arith.addf %20, %22 : vector<48x128xbf16>
    %cst_17 = arith.constant 0.000000e+00 : bf16
    %24 = vector.broadcast %cst_17 : bf16 to vector<48x128xbf16>
    %25 = arith.maximumf %23, %24 : vector<48x128xbf16>
    %c0_18 = arith.constant 0 : index
    %c0_19 = arith.constant 0 : index
    %26 = vector.load %arg8[%c0_18, %c0_19] : memref<128x8xbf16, #tpu.memory_space<vmem>>, vector<128x8xbf16>
    %cst_20 = arith.constant dense<0.000000e+00> : vector<48x8xf32>
    %27 = tpu.matmul %25, %26, %cst_20 {dimension_numbers = #tpu.dot_dimension_numbers<[1], [0], [0], [1], [0, 0, 1, 1], [], []>} : vector<48x128xbf16>, vector<128x8xbf16>, vector<48x8xf32> -> vector<48x8xf32>
    %c0_21 = arith.constant 0 : index
    %c0_22 = arith.constant 0 : index
    %28 = vector.load %arg9[%c0_21, %c0_22] : memref<1x8xf32, #tpu.memory_space<vmem>>, vector<1x8xf32>
    %29 = vector.broadcast %28 : vector<1x8xf32> to vector<48x8xf32>
    %30 = arith.addf %27, %29 : vector<48x8xf32>
    %31 = math.tanh %30 : vector<48x8xf32>
    %c0_23 = arith.constant 0 : index
    %c0_24 = arith.constant 0 : index
    %32 = vector.load %arg10[%c0_23, %c0_24] : memref<48x8xf32, #tpu.memory_space<vmem>>, vector<48x8xf32>
    tpu.vector_store %arg10[%c0_23, %c0_24], %31 {strides = array<i32>} : memref<48x8xf32, #tpu.memory_space<vmem>>, vector<48x8xf32>,
    return
  }
  func.func @transform_0(%arg0: i32) -> (i32, i32) {
    %c0_i32 = arith.constant 0 : i32
    %c0_i32_0 = arith.constant 0 : i32
    return %arg0, %c0_i32 : i32, i32
  }
  func.func @transform_1(%arg0: i32) -> (i32, i32) {
    %c0_i32 = arith.constant 0 : i32
    %c0_i32_0 = arith.constant 0 : i32
    %c0_i32_1 = arith.constant 0 : i32
    return %c0_i32, %c0_i32_0 : i32, i32
  }
  func.func @transform_2(%arg0: i32) -> (i32, i32) {
    %c0_i32 = arith.constant 0 : i32
    %c0_i32_0 = arith.constant 0 : i32
    %c0_i32_1 = arith.constant 0 : i32
    return %c0_i32, %c0_i32_0 : i32, i32
  }
  func.func @transform_3(%arg0: i32) -> (i32, i32) {
    %c0_i32 = arith.constant 0 : i32
    %c0_i32_0 = arith.constant 0 : i32
    %c0_i32_1 = arith.constant 0 : i32
    return %c0_i32, %c0_i32_0 : i32, i32
  }
  func.func @transform_4(%arg0: i32) -> (i32, i32) {
    %c0_i32 = arith.constant 0 : i32
    %c0_i32_0 = arith.constant 0 : i32
    %c0_i32_1 = arith.constant 0 : i32
    return %c0_i32, %c0_i32_0 : i32, i32
  }
  func.func @transform_5(%arg0: i32) -> (i32, i32) {
    %c0_i32 = arith.constant 0 : i32
    %c0_i32_0 = arith.constant 0 : i32
    %c0_i32_1 = arith.constant 0 : i32
    return %c0_i32, %c0_i32_0 : i32, i32
  }
  func.func @transform_6(%arg0: i32) -> (i32, i32) {
    %c0_i32 = arith.constant 0 : i32
    %c0_i32_0 = arith.constant 0 : i32
    %c0_i32_1 = arith.constant 0 : i32
    return %c0_i32, %c0_i32_0 : i32, i32
  }
  func.func @transform_7(%arg0: i32) -> (i32, i32) {
    %c0_i32 = arith.constant 0 : i32
    %c0_i32_0 = arith.constant 0 : i32
    %c0_i32_1 = arith.constant 0 : i32
    return %c0_i32, %c0_i32_0 : i32, i32
  }
  func.func @transform_8(%arg0: i32) -> (i32, i32) {
    %c0_i32 = arith.constant 0 : i32
    %c0_i32_0 = arith.constant 0 : i32
    %c0_i32_1 = arith.constant 0 : i32
    return %c0_i32, %c0_i32_0 : i32, i32
  }
  func.func @transform_9(%arg0: i32) -> (i32, i32) {
    %c0_i32 = arith.constant 0 : i32
    %c0_i32_0 = arith.constant 0 : i32
    return %arg0, %c0_i32 : i32, i32
  }
}

</mosaic_0001>

<bundles_post_ra>
// kernel: actor_forward.1
= control target key start
LH: loop header
LB: loop body
LE: loop exit
PB: predicated region body
PF: predicated region fallthrough
CT: control target
= control target key end

     0   :  { %14 = vsyncpa [#allocation3], 0  ;;  %s1445_s0 = inlined_call_operand.vmem [shape: f32[40,32], index: 0, kind: input, shape index: {}]   ;;  %s1446_s1 = inlined_call_operand.hbm [shape: bf16[32,256], index: 1, kind: input, shape index: {}]   ;;  %s1447_s2 = inlined_call_operand.vmem [shape: bf16[1,256], index: 2, kind: input, shape index: {}]   ;;  %s1448_s3 = inlined_call_operand.hbm [shape: bf16[256,256], index: 3, kind: input, shape index: {}]   ;;  %s1449_s4 = inlined_call_operand.vmem [shape: bf16[1,256], index: 4, kind: input, shape index: {}]   ;;  %s1450_s5 = inlined_call_operand.vmem [shape: bf16[256,128], index: 5, kind: input, shape index: {}]   ;;  %s1451_s6 = inlined_call_operand.vmem [shape: bf16[1,128], index: 6, kind: input, shape index: {}]   ;;  %s1452_s7 = inlined_call_operand.vmem [shape: bf16[128,8], index: 7, kind: input, shape index: {}]   ;;  %s1453_s8 = inlined_call_operand.vmem [shape: f32[1,8], index: 8, kind: input, shape index: {}]   ;;  %s1454_s9 = inlined_call_operand.vmem [shape: f32[40,8], index: 9, kind: output, shape index: {}]  }
   0x1   :  { %15 = vsyncpa [#allocation5], 0  ;;  %s1217_s30 = smov [#allocation2]  }
   0x2   :  { %s23_s10 = sshll.u32 %s1217_s30, 4  ;;  %s24_s10 = int_to_ptr.vmem [resolvable:$true] %s23_s10 }
   0x3   :  { %s1181_s11 = scalar_lea.vmem %s24_s10, 512  ;;  %p1186_p1 = scmp.lt.s32.totalorder %s24_s10, %s24_s10 }
   0x4   :  { %p1182_p0 = scmp.ne.s32.totalorder %s24_s10, %s1181_s11  ;;  %p1187_p2 = scmp.lt.s32.totalorder %s1181_s11, %s1181_s11 }
   0x6   :  { %p1188_p3 = por %p1187_p2, %p1186_p1 }
   0x8   :  { %p1189_p4 = pnand %p1188_p3, %p1182_p0 }
   0xa   :  { %1192 = shalt.err (!%p1189_p4)
}
   0xb   :  { %s1218_s12 = smov 128   ;;  %s1219_s13 = smov 8  }
   0xc   :  { %29 = dma.hbm_to_vmem [thread:$0]  %s1446_s1, 512, %s24_s10, [#allocation3], %s1218_s12, %s1218_s12, %s1219_s13  }
   0xd   :  { %s1220_s16 = smov [#allocation4]  }
   0xe   :  { %s37_s17 = sshll.u32 %s1220_s16, 4  ;;  %s38_s17 = int_to_ptr.vmem [resolvable:$true] %s37_s17 }
   0xf   :  { %s1201_s18 = scalar_lea.vmem %s38_s17, 4096  ;;  %p1206_p6 = scmp.lt.s32.totalorder %s38_s17, %s38_s17 }
  0x10   :  { %p1202_p5 = scmp.ne.s32.totalorder %s38_s17, %s1201_s18  ;;  %p1207_p7 = scmp.lt.s32.totalorder %s1201_s18, %s1201_s18 }
  0x12   :  { %p1208_p8 = por %p1207_p7, %p1206_p6 }
  0x14   :  { %p1209_p9 = pnand %p1208_p8, %p1202_p5 }
  0x16   :  { %1212 = shalt.err (!%p1209_p9)
}
  0x17   :  { %43 = dma.hbm_to_vmem [thread:$0]  %s1448_s3, 4096, %s38_s17, [#allocation5], %s1218_s12, %s1218_s12, %s1219_s13  }
  0x18   :  { %1213 = dma.done.wait [#allocation3], 512  }
  0x19   :  { %1214 = vsyncadd [#allocation3], 4294966784 }
  0x1a   :  { %1215 = dma.done.wait [#allocation5], 4096  }
  0x1b   :  { %1216 = vsyncadd [#allocation5], 4294963200  ;;  %v1221_v0 = vmov 0   ;;  %v1083_v1 = vld [vmem:[#allocation2 + $0x14] ss:$8 sps:$4 sm:$0xff]   ;;  %v61_v5 = vld [vmem:[%s1445_s0] sm:$0xff]  ;;  %v186_v58 = vlaneseq }
  0x1c   :  { %136 = vmatprep.mubr.bf16.mxu0 %v1221_v0  ;;  %v1085_v2 = vld [vmem:[#allocation2 + $0x10] ss:$8 sps:$4 sm:$0xff]   ;;  %116 = vmatprep.subr.bf16.mxu0 %v1083_v1  ;;  %v1086_v3 = vld [vmem:[#allocation2 + $0x4] ss:$8 sps:$4 sm:$0xff]   ;;  %v1088_v4 = vld [vmem:[#allocation2] ss:$8 sps:$4 sm:$0xff]  }
  0x1d   :  { %117 = vmatpush1.bf16.msra.mxu0 %v1085_v2  ;;  %v62_v6 = vld [vmem:[%s1445_s0 + $0x8] sm:$0xff]  ;;  %v1089_v7 = vld [vmem:[#allocation4 + $0x74] ss:$8 sps:$4 sm:$0xff]   ;;  %v1091_v8 = vld [vmem:[#allocation4 + $0x70] ss:$8 sps:$4 sm:$0xff]   ;;  %vm94_vm0 = vcmask 261120  }
  0x1e   :  { %118 = vmatprep.subr.bf16.mxu0 %v1086_v3  ;;  %v67_v9 = vpack.c.bf16 %v62_v6, %v61_v5  ;;  %v1092_v10 = vld [vmem:[#allocation4 + $0x64] ss:$8 sps:$4 sm:$0xff]   ;;  %415 = vmatprep.subr.bf16.mxu1 %v1089_v7  ;;  %v1094_v11 = vld [vmem:[#allocation4 + $0x60] ss:$8 sps:$4 sm:$0xff]   ;;  %v1095_v12 = vld [vmem:[#allocation4 + $0x54] ss:$8 sps:$4 sm:$0xff]  }
  0x1f   :  { %416 = vmatpush1.bf16.msra.mxu1 %v1091_v8  ;;  %v63_v13 = vld [vmem:[%s1445_s0 + $0x10] sm:$0xff]  ;;  %v64_v14 = vld [vmem:[%s1445_s0 + $0x18] sm:$0xff]  ;;  %v1098_v16 = vld [vmem:[#allocation4 + $0x44] ss:$8 sps:$4 sm:$0xff]   ;;  %v1222_v56 = vmov 1966171168  }
  0x20   :  { %417 = vmatprep.subr.bf16.mxu1 %v1092_v10  ;;  %v1097_v15 = vld [vmem:[#allocation4 + $0x50] ss:$8 sps:$4 sm:$0xff]   ;;  %v68_v17 = vpack.c.bf16 %v64_v14, %v63_v13  ;;  %v1100_v18 = vld [vmem:[#allocation4 + $0x40] ss:$8 sps:$4 sm:$0xff]   ;;  %v1101_v19 = vld [vmem:[#allocation4 + $0x34] ss:$8 sps:$4 sm:$0xff]   ;;  %v184_v57 = vunpack.c.l.s4 %v1222_v56 }
  0x21   :  { %119 = vmatpush1.bf16.msra.mxu0 %v1088_v4  ;;  %v65_v20 = vld [vmem:[%s1445_s0 + $0x20] sm:$0xff]  ;;  %v66_v21 = vld [vmem:[%s1445_s0 + $0x28] sm:$0xff]  ;;  %v1103_v22 = vld [vmem:[#allocation4 + $0x30] ss:$8 sps:$4 sm:$0xff]   ;;  %v187_v60 = vshrl.u32 %v186_v58, 7  ;;  %vm1224_vm1 = vmmov 0  }
  0x22   :  { %v1104_v23 = vld [vmem:[#allocation4 + $0x24] ss:$8 sps:$4 sm:$0xff]   ;;  %v69_v24 = vpack.c.bf16 %v66_v21, %v65_v20  ;;  %v1106_v25 = vld [vmem:[#allocation4 + $0x20] ss:$8 sps:$4 sm:$0xff]   ;;  %v1107_v26 = vld [vmem:[#allocation4 + $0x14] ss:$8 sps:$4 sm:$0xff]   ;;  %v185_v59 = vunpack.c.0.s8 %v184_v57 }
  0x23   :  { %418 = vmatpush1.bf16.msra.mxu1 %v1094_v11  ;;  %v1109_v27 = vld [vmem:[#allocation4 + $0x10] ss:$8 sps:$4 sm:$0xff]   ;;  %v1110_v28 = vld [vmem:[#allocation4 + $0x4] ss:$8 sps:$4 sm:$0xff]   ;;  %v1112_v29 = vld [vmem:[#allocation4] ss:$8 sps:$4 sm:$0xff]  }
  0x24   :  { %940 = vmatmul.mubr.msk.bf16.vlgmr.msra.gmra.mxu0 %vm94_vm0, %v67_v9  ;;  %419 = vmatprep.subr.bf16.mxu1 %v1095_v12  ;;  %v1113_v30 = vld [vmem:[#allocation4 + $0xf4] ss:$8 sps:$4 sm:$0xff]   ;;  %v1115_v31 = vld [vmem:[#allocation4 + $0xf0] ss:$8 sps:$4 sm:$0xff]   ;;  %v1116_v32 = vld [vmem:[#allocation4 + $0xe4] ss:$8 sps:$4 sm:$0xff]   ;;  %v188_v62 = vsub.s32 %v185_v59, %v187_v60 }
  0x25   :  { %146 = vmatprep.mubr.bf16.mxu0 %v1221_v0  ;;  %v1118_v33 = vld [vmem:[#allocation4 + $0xe0] ss:$8 sps:$4 sm:$0xff]   ;;  %v1119_v34 = vld [vmem:[#allocation4 + $0xd4] ss:$8 sps:$4 sm:$0xff]   ;;  %v1121_v35 = vld [vmem:[#allocation4 + $0xd0] ss:$8 sps:$4 sm:$0xff]  }
  0x26   :  { %v1122_v36 = vld [vmem:[#allocation4 + $0xc4] ss:$8 sps:$4 sm:$0xff]   ;;  %v1124_v37 = vld [vmem:[#allocation4 + $0xc0] ss:$8 sps:$4 sm:$0xff]   ;;  %v1125_v38 = vld [vmem:[#allocation4 + $0xb4] ss:$8 sps:$4 sm:$0xff]  }
  0x27   :  { %420 = vmatpush1.bf16.msra.mxu1 %v1097_v15  ;;  %v1127_v39 = vld [vmem:[#allocation4 + $0xb0] ss:$8 sps:$4 sm:$0xff]   ;;  %v1128_v40 = vld [vmem:[#allocation4 + $0xa4] ss:$8 sps:$4 sm:$0xff]   ;;  %v1130_v41 = vld [vmem:[#allocation4 + $0xa0] ss:$8 sps:$4 sm:$0xff]  }
  0x28   :  { %421 = vmatprep.subr.bf16.mxu1 %v1098_v16  ;;  %v1131_v42 = vld [vmem:[#allocation4 + $0x94] ss:$8 sps:$4 sm:$0xff]   ;;  %v1133_v43 = vld [vmem:[#allocation4 + $0x90] ss:$8 sps:$4 sm:$0xff]   ;;  %v1134_v44 = vld [vmem:[#allocation4 + $0x84] ss:$8 sps:$4 sm:$0xff]  }
  0x29   :  { %v1136_v45 = vld [vmem:[#allocation4 + $0x80] ss:$8 sps:$4 sm:$0xff]   ;;  %v1137_v46 = vld [vmem:[%s1450_s5 + $0x78] sm:$0xff]   ;;  %v1139_v48 = vld [vmem:[%s1450_s5 + $0x70] sm:$0xff]   ;;  %v1338_v5 = vsub.s32 0, %v187_v60  ;;  %vm870_vm2 = vcmask 64512  }
  0x2a   :  { %v1138_v47 = vld [vmem:[%s1450_s5 + $0x38] sm:$0xff]   ;;  %1002 = vmatprep.subr.bf16.mxu0 %v1137_v46  ;;  %v1140_v49 = vld [vmem:[%s1450_s5 + $0x30] sm:$0xff]   ;;  %v1141_v50 = vld [vmem:[%s1450_s5 + $0x68] sm:$0xff]  }
  0x2b   :  { %422 = vmatpush1.bf16.msra.mxu1 %v1100_v18  ;;  %1003 = vmatpush3.bf16.msra.mxu0 %v1138_v47  ;;  %v1142_v51 = vld [vmem:[%s1450_s5 + $0x28] sm:$0xff]   ;;  %v1143_v52 = vld [vmem:[%s1450_s5 + $0x60] sm:$0xff]   ;;  %v1145_v54 = vld [vmem:[%s1450_s5 + $0x58] sm:$0xff]  }
  0x2c   :  { %941 = vmatmul.mubr.msk.bf16.gmra.mxu0 %vm94_vm0, %v68_v17  ;;  %423 = vmatprep.subr.bf16.mxu1 %v1101_v19  ;;  %v1144_v53 = vld [vmem:[%s1450_s5 + $0x20] sm:$0xff]   ;;  %v1146_v55 = vld [vmem:[%s1450_s5 + $0x18] sm:$0xff]  }
  0x2d   :  { %156 = vmatprep.mubr.bf16.mxu0 %v1221_v0  ;;  %1004 = vmatprep.subr.bf16.mxu0 %v1139_v48  ;;  %v943_v61 = vld.sshfl [vmem:[%s1447_s2] sm:$0x11 pattern:$0x75316420] }
  0x2e   :  { %v182_v63 = vcombine.high %v943_v61, %v943_v61  ;;  %v189_v1 = vrot.slane %v943_v61, %v188_v62 }
  0x2f   :  { %424 = vmatpush1.bf16.msra.mxu1 %v1103_v22  ;;  %1005 = vmatpush3.bf16.msra.mxu0 %v1140_v49 }
  0x30   :  { %425 = vmatprep.subr.bf16.mxu1 %v1104_v23  ;;  %1006 = vmatprep.subr.bf16.mxu0 %v1141_v50  ;;  %v196_v2 = vrot.slane %v182_v63, %v188_v62  ;;  %v198_v4 = vpack.i.b16 %v189_v1, %v189_v1 }
  0x32   :  { %v205_v6 = vpack.i.b16 %v196_v2, %v196_v2  ;;  %v203_v9 = vrot.slane %v198_v4, %v1338_v5 }
  0x33   :  { %426 = vmatpush1.bf16.msra.mxu1 %v1106_v25  ;;  %1007 = vmatpush3.bf16.msra.mxu0 %v1142_v51 }
  0x34   :  { %942 = vmatmul.mubr.msk.bf16.gmra.mxu0 %vm94_vm0, %v69_v24  ;;  %427 = vmatprep.subr.bf16.mxu1 %v1107_v26  ;;  %v210_v11 = vrot.slane %v205_v6, %v1338_v5 }
  0x35   :  { %1008 = vmatprep.subr.bf16.mxu0 %v1143_v52 }
  0x37   :  { %428 = vmatpush1.bf16.msra.mxu1 %v1109_v27  ;;  %1009 = vmatpush3.bf16.msra.mxu0 %v1144_v53 }
  0x38   :  { %429 = vmatprep.subr.bf16.mxu1 %v1110_v28  ;;  %1010 = vmatprep.subr.bf16.mxu0 %v1145_v54 }
  0x3b   :  { %430 = vmatpush1.bf16.msra.mxu1 %v1112_v29  ;;  %1011 = vmatpush3.bf16.msra.mxu0 %v1146_v55 }
  0x3c   :  { %431 = vmatprep.subr.bf16.mxu1 %v1113_v30 }
  0x3f   :  { %432 = vmatpush2.bf16.msra.mxu1 %v1115_v31 }
  0x40   :  { %433 = vmatprep.subr.bf16.mxu1 %v1116_v32 }
  0x43   :  { %434 = vmatpush2.bf16.msra.mxu1 %v1118_v33 }
  0x44   :  { %435 = vmatprep.subr.bf16.mxu1 %v1119_v34 }
  0x47   :  { %436 = vmatpush2.bf16.msra.mxu1 %v1121_v35 }
  0x48   :  { %437 = vmatprep.subr.bf16.mxu1 %v1122_v36 }
  0x4b   :  { %438 = vmatpush2.bf16.msra.mxu1 %v1124_v37 }
  0x4c   :  { %439 = vmatprep.subr.bf16.mxu1 %v1125_v38  ;;  %v1147_v38 = vld [vmem:[%s1450_s5 + $0x50] sm:$0xff]  }
  0x4d   :  { %1012 = vmatprep.subr.bf16.mxu0 %v1147_v38 }
  0x4f   :  { %440 = vmatpush2.bf16.msra.mxu1 %v1127_v39  ;;  %v1148_v39 = vld [vmem:[%s1450_s5 + $0x10] sm:$0xff]  }
  0x50   :  { %441 = vmatprep.subr.bf16.mxu1 %v1128_v40  ;;  %1013 = vmatpush3.bf16.msra.mxu0 %v1148_v39  ;;  %v1149_v40 = vld [vmem:[%s1450_s5 + $0x48] sm:$0xff]  }
  0x51   :  { %1014 = vmatprep.subr.bf16.mxu0 %v1149_v40 }
  0x53   :  { %442 = vmatpush2.bf16.msra.mxu1 %v1130_v41  ;;  %v1150_v41 = vld [vmem:[%s1450_s5 + $0x8] sm:$0xff]  }
  0x54   :  { %443 = vmatprep.subr.bf16.mxu1 %v1131_v42  ;;  %1015 = vmatpush3.bf16.msra.mxu0 %v1150_v41  ;;  %v1151_v42 = vld [vmem:[%s1450_s5 + $0x40] sm:$0xff]  }
  0x55   :  { %1016 = vmatprep.subr.bf16.mxu0 %v1151_v42 }
  0x57   :  { %444 = vmatpush2.bf16.msra.mxu1 %v1133_v43  ;;  %v1152_v43 = vld [vmem:[%s1450_s5] sm:$0xff]  }
  0x58   :  { %445 = vmatprep.subr.bf16.mxu1 %v1134_v44  ;;  %1017 = vmatpush3.bf16.msra.mxu0 %v1152_v43  ;;  %v1223_v44 = vmov 0.0  }
  0x59   :  { %1047 = vmatprep.subr.bf16.mxu0 %v1223_v44 }
  0x5b   :  { %446 = vmatpush2.bf16.msra.mxu1 %v1136_v45  ;;  %v976_v45 = vld.sshfl [vmem:[%s1449_s4] sm:$0x11 pattern:$0x75316420] }
  0x5c   :  { %v493_v46 = vcombine.high %v976_v45, %v976_v45  ;;  %v500_v47 = vrot.slane %v976_v45, %v188_v62 }
  0x5e   :  { %v507_v48 = vrot.slane %v493_v46, %v188_v62  ;;  %v509_v50 = vpack.i.b16 %v500_v47, %v500_v47  ;;  %v1153_v62 = vld [vmem:[%s1452_s7 + $0x38] sm:$0xff]  }
  0x60   :  { %v516_v51 = vpack.i.b16 %v507_v48, %v507_v48  ;;  %v514_v54 = vrot.slane %v509_v50, %v1338_v5 }
  0x62   :  { %v521_v56 = vrot.slane %v516_v51, %v1338_v5 }
  0xe4   :  { %v138_v3 = vpop.f32.mrf.mxu0 }
  0xe6   :  { %v140_v7 = vpop.f32.mrf.mxu0 }
  0xe8   :  { %v142_v8 = vpop.f32.mrf.mxu0 }
  0xe9   :  { %v167_v10 = vpack.c.bf16 %v142_v8, %v138_v3  ;;  %v1154_v8 = vld [vmem:[%s1452_s7 + $0x30] sm:$0xff]  }
  0xea   :  { %v144_v12 = vpop.f32.mrf.mxu0 }
  0xeb   :  { %v168_v13 = vpack.c.bf16 %v144_v12, %v140_v7  ;;  %v211_v14 = vadd.bf16 %v203_v9, %v167_v10 }
  0xec   :  { %v148_v15 = vpop.f32.mrf.mxu0 }
  0xed   :  { %v212_v16 = vadd.bf16 %v210_v11, %v168_v13  ;;  %v217_v20 = vmax.bf16 %v1221_v0, %v211_v14  ;;  %v1155_v14 = vld [vmem:[%s1452_s7 + $0x28] sm:$0xff]  }
  0xee   :  { %v150_v17 = vpop.f32.mrf.mxu0 }
  0xef   :  { %v218_v18 = vmax.bf16 %v1221_v0, %v212_v16 }
  0xf0   :  { %v152_v19 = vpop.f32.mrf.mxu0 }
  0xf1   :  { %v169_v21 = vpack.c.bf16 %v152_v19, %v148_v15  ;;  %447 = vmatprep.mubr.bf16.mxu1 %v218_v18 }
  0xf2   :  { %v154_v22 = vpop.f32.mrf.mxu0  ;;  %448 = vmatmul.mubr.bf16.vlgmr.msra.gmra.mxu1 %v217_v20  ;;  %v1156_v20 = vld [vmem:[%s1452_s7 + $0x20] sm:$0xff]  }
  0xf3   :  { %v170_v23 = vpack.c.bf16 %v154_v22, %v150_v17  ;;  %v213_v24 = vadd.bf16 %v203_v9, %v169_v21 }
  0xf4   :  { %v158_v25 = vpop.f32.mrf.mxu0 }
  0xf5   :  { %v214_v26 = vadd.bf16 %v210_v11, %v170_v23  ;;  %v219_v30 = vmax.bf16 %v1221_v0, %v213_v24 }
  0xf6   :  { %v160_v27 = vpop.f32.mrf.mxu0 }
  0xf7   :  { %v220_v28 = vmax.bf16 %v1221_v0, %v214_v26  ;;  %v1158_v26 = vld [vmem:[%s1452_s7 + $0x10] sm:$0xff]  }
  0xf8   :  { %v162_v29 = vpop.f32.mrf.mxu0 }
  0xf9   :  { %v171_v31 = vpack.c.bf16 %v162_v29, %v158_v25  ;;  %457 = vmatprep.mubr.bf16.mxu1 %v220_v28  ;;  %v1157_v25 = vld [vmem:[%s1452_s7 + $0x18] sm:$0xff]   ;;  %v1160_v28 = vld [vmem:[%s1452_s7] sm:$0xff]  }
  0xfa   :  { %v164_v32 = vpop.f32.mrf.mxu0  ;;  %458 = vmatmul.mubr.bf16.gmra.mxu1 %v219_v30  ;;  %v722_v30 = vld [vmem:[%s1451_s6] sm:$0x1] }
  0xfb   :  { %v172_v33 = vpack.c.bf16 %v164_v32, %v160_v27  ;;  %v215_v34 = vadd.bf16 %v203_v9, %v171_v31  ;;  %v1159_v27 = vld [vmem:[%s1452_s7 + $0x8] sm:$0xff]   ;;  %v724_v32 = vpack.i.b16 %v722_v30, %v722_v30 }
  0xfd   :  { %v216_v35 = vadd.bf16 %v210_v11, %v172_v33  ;;  %v221_v37 = vmax.bf16 %v1221_v0, %v215_v34 }
  0xff   :  { %v222_v36 = vmax.bf16 %v1221_v0, %v216_v35 }
 0x101   :  { %467 = vmatprep.mubr.bf16.mxu1 %v222_v36 }
 0x102   :  { %468 = vmatmul.mubr.bf16.gmra.mxu1 %v221_v37  ;;  %v729_v37 = vrot.slane %v724_v32, %v1338_v5 }
 0x1b2   :  { %v449_v49 = vpop.f32.mrf.mxu1 }
 0x1b4   :  { %v451_v52 = vpop.f32.mrf.mxu1 }
 0x1b6   :  { %v453_v53 = vpop.f32.mrf.mxu1 }
 0x1b7   :  { %v478_v55 = vpack.c.bf16 %v453_v53, %v449_v49 }
 0x1b8   :  { %v455_v57 = vpop.f32.mrf.mxu1 }
 0x1b9   :  { %v479_v58 = vpack.c.bf16 %v455_v57, %v451_v52  ;;  %v522_v59 = vadd.bf16 %v514_v54, %v478_v55 }
 0x1ba   :  { %v459_v60 = vpop.f32.mrf.mxu1 }
 0x1bb   :  { %v523_v61 = vadd.bf16 %v521_v56, %v479_v58  ;;  %v528_v2 = vmax.bf16 %v1221_v0, %v522_v59  ;;  %v993_v59 = vld [vmem:[%s1453_s8] ss:$0 sm:$0xff] }
 0x1bc   :  { %v461_v63 = vpop.f32.mrf.mxu1 }
 0x1bd   :  { %v529_v1 = vmax.bf16 %v1221_v0, %v523_v61 }
 0x1be   :  { %v463_v3 = vpop.f32.mrf.mxu1 }
 0x1bf   :  { %v480_v4 = vpack.c.bf16 %v463_v3, %v459_v60  ;;  %694 = vmatprep.mubr.bf16.mxu0 %v529_v1 }
 0x1c0   :  { %v465_v6 = vpop.f32.mrf.mxu1  ;;  %695 = vmatmul.mubr.bf16.vlgmr.msra.gmra.mxu0 %v528_v2 }
 0x1c1   :  { %v481_v7 = vpack.c.bf16 %v465_v6, %v461_v63  ;;  %1048 = vmatpush3.bf16.msra.mxu0 %v1153_v62  ;;  %v524_v9 = vadd.bf16 %v514_v54, %v480_v4 }
 0x1c2   :  { %v469_v10 = vpop.f32.mrf.mxu1  ;;  %1049 = vmatprep.subr.bf16.mxu0 %v1223_v44 }
 0x1c3   :  { %v525_v11 = vadd.bf16 %v521_v56, %v481_v7  ;;  %v530_v16 = vmax.bf16 %v1221_v0, %v524_v9 }
 0x1c4   :  { %v471_v12 = vpop.f32.mrf.mxu1 }
 0x1c5   :  { %v531_v13 = vmax.bf16 %v1221_v0, %v525_v11  ;;  %1050 = vmatpush3.bf16.msra.mxu0 %v1154_v8 }
 0x1c6   :  { %v473_v15 = vpop.f32.mrf.mxu1  ;;  %1051 = vmatprep.subr.bf16.mxu0 %v1223_v44 }
 0x1c7   :  { %v482_v17 = vpack.c.bf16 %v473_v15, %v469_v10  ;;  %702 = vmatprep.mubr.bf16.mxu0 %v531_v13 }
 0x1c8   :  { %v475_v18 = vpop.f32.mrf.mxu1  ;;  %703 = vmatmul.mubr.bf16.gmra.mxu0 %v530_v16 }
 0x1c9   :  { %v483_v19 = vpack.c.bf16 %v475_v18, %v471_v12  ;;  %1052 = vmatpush3.bf16.msra.mxu0 %v1155_v14  ;;  %v526_v21 = vadd.bf16 %v514_v54, %v482_v17 }
 0x1ca   :  { %1053 = vmatprep.subr.bf16.mxu0 %v1223_v44 }
 0x1cb   :  { %v527_v22 = vadd.bf16 %v521_v56, %v483_v19  ;;  %v532_v24 = vmax.bf16 %v1221_v0, %v526_v21 }
 0x1cd   :  { %v533_v23 = vmax.bf16 %v1221_v0, %v527_v22  ;;  %1054 = vmatpush3.bf16.msra.mxu0 %v1156_v20 }
 0x1ce   :  { %1055 = vmatprep.subr.bf16.mxu0 %v1223_v44 }
 0x1cf   :  { %710 = vmatprep.mubr.bf16.mxu0 %v533_v23 }
 0x1d0   :  { %711 = vmatmul.mubr.bf16.gmra.mxu0 %v532_v24 }
 0x1d1   :  { %1056 = vmatpush3.bf16.msra.mxu0 %v1157_v25  ;;  %1063 = vmatprep.mubr.msk.bf16.mxu0 %vm1224_vm1, %v1223_v44 }
 0x1d2   :  { %1057 = vmatprep.subr.bf16.mxu0 %v1223_v44 }
 0x1d5   :  { %1058 = vmatpush3.bf16.msra.mxu0 %v1158_v26 }
 0x1d6   :  { %1059 = vmatprep.subr.bf16.mxu0 %v1223_v44 }
 0x1d9   :  { %1060 = vmatpush3.bf16.msra.mxu0 %v1159_v27 }
 0x1da   :  { %1061 = vmatprep.subr.bf16.mxu0 %v1223_v44 }
 0x1dd   :  { %1062 = vmatpush3.bf16.msra.mxu0 %v1160_v28 }
 0x280   :  { %v1018_v29 = vpop.f32.mrf.mxu0 }
 0x282   :  { %v1019_v31 = vpop.f32.mrf.mxu0 }
 0x283   :  { %v1020_v35 = vadd.f32 %v1019_v31, %v1018_v29 }
 0x284   :  { %v1021_v33 = vpop.f32.mrf.mxu0 }
 0x286   :  { %v1022_v34 = vpop.f32.mrf.mxu0 }
 0x287   :  { %v1023_v36 = vadd.f32 %v1022_v34, %v1021_v33 }
 0x288   :  { %v1024_v38 = vpop.f32.mrf.mxu0 }
 0x289   :  { %v719_v39 = vpack.c.bf16 %v1023_v36, %v1020_v35 }
 0x28a   :  { %v1025_v40 = vpop.f32.mrf.mxu0 }
 0x28b   :  { %v730_v41 = vadd.bf16 %v729_v37, %v719_v39  ;;  %v1026_v46 = vadd.f32 %v1025_v40, %v1024_v38 }
 0x28c   :  { %v1027_v42 = vpop.f32.mrf.mxu0 }
 0x28d   :  { %v733_v43 = vmax.bf16 %v1221_v0, %v730_v41 }
 0x28e   :  { %v1028_v45 = vpop.f32.mrf.mxu0 }
 0x28f   :  { %v1029_v47 = vadd.f32 %v1028_v45, %v1027_v42  ;;  %1064 = vmatmul.mubr.bf16.vlgmr.msra.gmra.mxu0 %v733_v43 }
 0x290   :  { %v1030_v48 = vpop.f32.mrf.mxu0  ;;  %1067 = vmatprep.mubr.msk.bf16.mxu0 %vm1224_vm1, %v1223_v44 }
 0x291   :  { %v720_v49 = vpack.c.bf16 %v1029_v47, %v1026_v46 }
 0x292   :  { %v1031_v50 = vpop.f32.mrf.mxu0 }
 0x293   :  { %v731_v51 = vadd.bf16 %v729_v37, %v720_v49  ;;  %v1032_v54 = vadd.f32 %v1031_v50, %v1030_v48 }
 0x294   :  { %v1033_v52 = vpop.f32.mrf.mxu0 }
 0x295   :  { %v734_v5 = vmax.bf16 %v1221_v0, %v731_v51 }
 0x296   :  { %v1034_v53 = vpop.f32.mrf.mxu0 }
 0x297   :  { %v1035_v55 = vadd.f32 %v1034_v53, %v1033_v52  ;;  %1068 = vmatmul.mubr.bf16.gmra.mxu0 %v734_v5 }
 0x298   :  { %1071 = vmatprep.mubr.msk.bf16.mxu0 %vm1224_vm1, %v1223_v44 }
 0x299   :  { %v721_v56 = vpack.c.bf16 %v1035_v55, %v1032_v54 }
 0x29b   :  { %v732_v57 = vadd.bf16 %v729_v37, %v721_v56 }
 0x29d   :  { %v735_v58 = vmax.bf16 %v1221_v0, %v732_v57 }
 0x29f   :  { %1072 = vmatmul.mubr.bf16.gmra.mxu0 %v735_v58 }
 0x34f   :  { %v841_v60 = vpop.f32.mrf.mxu0 }
 0x350   :  { %v842_v61 = vadd.f32 %v993_v59, %v841_v60 }
 0x351   :  { %v1065_v63 = vpop.f32.mrf.mxu0 }
 0x352   :  { %1161 = vtanh.f32 %v842_v61 }
 0x353   :  { %v844_v1 = vpop.f32.mrf.mxu0 }
 0x354   :  { %v845_v62 = vadd.f32 %v993_v59, %v844_v1 }
 0x355   :  { %v1066_v2 = vpop.f32.mrf.mxu0 }
 0x356   :  { %1163 = vtanh.f32 %v845_v62 }
 0x357   :  { %v849_v3 = vpop.f32.mrf.mxu0 }
 0x358   :  { %v850_v4 = vadd.f32 %v993_v59, %v849_v3 }
 0x359   :  { %v1069_v44 = vpop.f32.mrf.mxu0 }
 0x35a   :  { %1165 = vtanh.f32 %v850_v4 }
 0x35b   :  { %v852_v6 = vpop.f32.mrf.mxu0 }
 0x35c   :  { %v853_v7 = vadd.f32 %v993_v59, %v852_v6 }
 0x35d   :  { %v1070_v0 = vpop.f32.mrf.mxu0 }
 0x35e   :  { %1167 = vtanh.f32 %v853_v7 }
 0x35f   :  { %v1162_v8 = vpop.eup %1161  ;;  %v857_v9 = vpop.f32.mrf.mxu0 }
 0x360   :  { %871 = vst.msk [vmem:[#allocation6] sm:$0xff] %vm870_vm2, %v1162_v8  ;;  %v858_v10 = vadd.f32 %v993_v59, %v857_v9 }
 0x361   :  { %v1073_v11 = vpop.f32.mrf.mxu0 }
 0x362   :  { %1169 = vtanh.f32 %v858_v10 }
 0x363   :  { %v1164_v12 = vpop.eup %1163  ;;  %v860_v13 = vpop.f32.mrf.mxu0 }
 0x364   :  { %872 = vst.msk [vmem:[#allocation6 + $0x8] sm:$0xff] %vm870_vm2, %v1164_v12  ;;  %v861_v14 = vadd.f32 %v993_v59, %v860_v13 }
 0x365   :  { %v1074_v15 = vpop.f32.mrf.mxu0 }
 0x366   :  { %1171 = vtanh.f32 %v861_v14 }
 0x367   :  { %v1166_v16 = vpop.eup %1165  ;;  %v915_v17 = vld [vmem:[#allocation6] sm:$0xff] }
 0x368   :  { %916 = vst [vmem:[%s1454_s9] sm:$0xff] %v915_v17  ;;  %873 = vst.msk [vmem:[#allocation6 + $0x10] sm:$0xff] %vm870_vm2, %v1166_v16 }
 0x36b   :  { %v1168_v18 = vpop.eup %1167  ;;  %v917_v19 = vld [vmem:[#allocation6 + $0x8] sm:$0xff] }
 0x36c   :  { %918 = vst [vmem:[%s1454_s9 + $0x8] sm:$0xff] %v917_v19  ;;  %874 = vst.msk [vmem:[#allocation6 + $0x18] sm:$0xff] %vm870_vm2, %v1168_v18 }
 0x36f   :  { %v1170_v20 = vpop.eup %1169  ;;  %v919_v21 = vld [vmem:[#allocation6 + $0x10] sm:$0xff] }
 0x370   :  { %920 = vst [vmem:[%s1454_s9 + $0x10] sm:$0xff] %v919_v21  ;;  %875 = vst.msk [vmem:[#allocation6 + $0x20] sm:$0xff] %vm870_vm2, %v1170_v20 }
 0x373   :  { %v1172_v22 = vpop.eup %1171  ;;  %v921_v23 = vld [vmem:[#allocation6 + $0x18] sm:$0xff] }
 0x374   :  { %922 = vst [vmem:[%s1454_s9 + $0x18] sm:$0xff] %v921_v23 }
 0x377   :  { %v923_v24 = vld [vmem:[#allocation6 + $0x20] sm:$0xff] }
 0x378   :  { %924 = vst [vmem:[%s1454_s9 + $0x20] sm:$0xff] %v923_v24 }
 0x379   :  { %930 = vsyncpa [#allocation3], 1 }
 0x37a   :  { %931 = vsyncpa [#allocation5], 1 }

</bundles_post_ra>
